<compile_context>
chip_gen: v7x
topology: tpu7x:2x2x1
jax: 0.10.0
libtpu: 0.0.40
codegen_flags: <defaults>
</compile_context>

<pallas_src>
import functools
import math

import jax
import jax.numpy as jnp
from jax.experimental import pallas as pl
from jax.experimental.pallas import tpu as pltpu


_TWO_PI = 2.0 * math.pi
_TWO_PI_HI = 6.28125                 # 8 mantissa bits -> k * HI is exact in f32
_TWO_PI_LO = _TWO_PI - _TWO_PI_HI
_INV_TWO_PI = 1.0 / _TWO_PI


def _round_up(n, m):
    return ((n + m - 1) // m) * m


def _vmem_budget_and_limit():
    """(double-buffered footprint budget, scoped vmem_limit_bytes) per chip gen."""
    cap = 0
    try:
        info = pltpu.get_tpu_info()
        cap = int(getattr(info, "vmem_capacity_bytes", 0) or 0)
    except Exception:
        cap = 0
    if cap >= (100 << 20):           # v5e / v6e: 128 MiB physical VMEM
        return 28 << 20, 64 << 20
    if cap > 0:                      # v7x: 64 MiB per TensorCore
        return 20 << 20, 40 << 20
    return 16 << 20, 40 << 20        # unknown generation: conservative but > defaults


def _choose_row_tile(d_model, x_itemsize, pe_itemsize, n_x_rows, pe_rows,
                     budget_bytes):
    """Pick the x row tile keeping the double-buffered VMEM footprint in budget.

    Per grid step (double-buffered): x-in + x-out tiles (real dtype), a pe-out
    tile of ~pe_rows/n_x_rows rows per x row, plus ~4 f32 temporaries for the
    angle / reduction / sin compute.
    """
    pe_per_x = pe_rows / max(n_x_rows, 1)                 # <= ~2 (B=1 case)
    per_row = (4.0 * x_itemsize                           # x in + out, 2x buffered
               + pe_per_x * (2.0 * pe_itemsize + 4 * 4.0) # pe out + f32 temps
               ) * d_model
    t = int(budget_bytes / max(per_row, 1.0))
    t = max(8, min(1024, (t // 8) * 8))                   # sublane multiple, cap 1024
    t = min(t, _round_up(n_x_rows, 8))                    # don't over-pad tiny problems
    return int(t)


def _fused_kernel(consts_ref, x_ref, xs_ref, pe_ref, *, xscale, seq_len, pe_tile):
    # ---- (a) x * sqrt(d_model): HBM-bound elementwise work (VPU). ----------
    xs_ref[...] = x_ref[...] * xscale

    # ---- (b) one (never revisited) row-tile of the relative pos. emb. ------
    i = pl.program_id(0)
    row0 = i * pe_tile

    # int32 row index -> relative position p = (T-1) - j (exact, no f32 drift).
    r = jax.lax.broadcasted_iota(jnp.int32, (pe_tile, 1), 0)
    p = ((seq_len - 1) - (row0 + r)).astype(jnp.float32)          # (tile, 1)

    inv_freq = consts_ref[0:1, :]                                 # (1, D)
    phase = consts_ref[1:2, :]                                    # (1, D): 0 or pi/2

    angle = p * inv_freq                                          # (tile, D)
    # Cody–Waite mod-2pi pre-reduction on the VPU (spare slots in this
    # mem-bound kernel) so the single EUP sin sees a small argument.
    k = jnp.floor(angle * _INV_TWO_PI + 0.5)
    angle = (angle - k * _TWO_PI_HI) - k * _TWO_PI_LO
    # One EUP sine per element: cos(a) = sin(a + pi/2) via per-channel phase.
    pe_ref[...] = jnp.sin(angle + phase).astype(pe_ref.dtype)


def espnet_rel_positional_encoding(x, d_model=None, offset=0):
    """Returns (x * sqrt(d_model), pos_emb) — eval-mode forward pass."""
    B, T, D = x.shape
    if d_model is None:
        d_model = D
    assert D == d_model
    xscale = math.sqrt(d_model)

    L = 2 * T - 1
    n_rows_x = B * T
    x2d = x.reshape(n_rows_x, D)            # lane-dense 2-D view (free reshape)

    x_itemsize = jnp.dtype(x.dtype).itemsize
    budget, vmem_limit = _vmem_budget_and_limit()
    x_tile = _choose_row_tile(D, x_itemsize, x_itemsize, n_rows_x, L, budget)

    n_tiles = pl.cdiv(n_rows_x, x_tile)
    # pos_emb gets its own tile so every grid step writes exactly one distinct
    # block of each output -> safe unconditional "parallel" (megacore).
    pe_tile = _round_up(pl.cdiv(L, n_tiles), 8)
    L_pad = n_tiles * pe_tile

    # Loop-invariant per-channel table, computed once outside the kernel:
    #   row 0: inv_freq (the even-index 10000^(-2k/D) frequencies, duplicated
    #          onto the paired odd channel), row 1: phase (pi/2 on odd channels).
    c = jnp.arange(D, dtype=jnp.int32)
    par = c % 2
    inv_freq = jnp.exp((c - par).astype(jnp.float32) * (-math.log(10000.0) / D))
    phase = par.astype(jnp.float32) * (math.pi / 2.0)
    consts = jnp.stack([inv_freq, phase], axis=0)                 # (2, D) f32

    kernel = functools.partial(
        _fused_kernel, xscale=xscale, seq_len=T, pe_tile=pe_tile)

    x_scaled2d, pe_pad = pl.pallas_call(
        kernel,
        out_shape=(jax.ShapeDtypeStruct((n_rows_x, D), x.dtype),
                   jax.ShapeDtypeStruct((L_pad, D), x.dtype)),
        grid=(n_tiles,),
        in_specs=[pl.BlockSpec((2, D), lambda i: (0, 0)),        # consts (tiny)
                  pl.BlockSpec((x_tile, D), lambda i: (i, 0))],
        out_specs=(pl.BlockSpec((x_tile, D), lambda i: (i, 0)),
                   pl.BlockSpec((pe_tile, D), lambda i: (i, 0))),
        compiler_params=pltpu.CompilerParams(
            dimension_semantics=("parallel",),
            vmem_limit_bytes=int(vmem_limit)),
    )(consts, x2d)

    # pos_emb is returned in x.dtype (as the PyTorch module casts pe to x.dtype).
    return x_scaled2d.reshape(B, T, D), pe_pad[:L].reshape(1, L, D)


def _reference(x, d_model, max_len=64):
    """Pure-JAX reproduction of the PyTorch module (eval mode)."""
    T = x.shape[1]
    pos = jnp.arange(max_len, dtype=jnp.float32)[:, None]
    div = jnp.exp(
        jnp.arange(0, d_model, 2, dtype=jnp.float32)
        * -(math.log(10000.0) / d_model)
    )
    pe_pos = (
        jnp.zeros((max_len, d_model), jnp.float32)
        .at[:, 0::2].set(jnp.sin(pos * div))
        .at[:, 1::2].set(jnp.cos(pos * div))
    )
    pe_neg = (
        jnp.zeros((max_len, d_model), jnp.float32)
        .at[:, 0::2].set(jnp.sin(-1 * pos * div))
        .at[:, 1::2].set(jnp.cos(-1 * pos * div))
    )
    pe = jnp.concatenate([jnp.flip(pe_pos, 0)[None], pe_neg[1:][None]], axis=1)
    x_s = x * math.sqrt(d_model)
    center = pe.shape[1] // 2
    pos_emb = pe[:, center - T + 1: center + T]
    return x_s, pos_emb


if __name__ == "__main__":
    key = jax.random.PRNGKey(0)
    k1, k2 = jax.random.split(key)

    # --- Test 1: small shapes, strict tolerance ------------------------------
    B, T, D = 2, 8, 32
    x = jax.random.normal(k1, (B, T, D), dtype=jnp.float32)
    x_out, pos_emb = espnet_rel_positional_encoding(x, D)
    jax.block_until_ready((x_out, pos_emb))
    x_ref, pe_ref = _reference(x, D, max_len=64)
    assert x_out.shape == (B, T, D)
    assert pos_emb.shape == (1, 2 * T - 1, D)
    assert jnp.allclose(x_out, x_ref, atol=1e-5, rtol=1e-5)
    assert jnp.allclose(pos_emb, pe_ref, atol=1e-5, rtol=1e-5)

    # --- Test 2: longer B=1 path (pe_tile ~ 2x x_tile), lane-dense D=128 -----
    B2, T2, D2 = 1, 300, 128
    x2 = jax.random.normal(k2, (B2, T2, D2), dtype=jnp.float32)
    x2_out, pe2_out = espnet_rel_positional_encoding(x2, D2)
    jax.block_until_ready((x2_out, pe2_out))
    x2_ref, pe2_ref = _reference(x2, D2, max_len=T2)
    assert x2_out.shape == (B2, T2, D2)
    assert pe2_out.shape == (1, 2 * T2 - 1, D2)
    assert jnp.allclose(x2_out, x2_ref, atol=1e-5, rtol=1e-5)
    # With the in-kernel mod-2pi pre-reduction the only mismatch vs. the
    # pure-JAX reference is each side's f32 sin/cos evaluation (~1e-5 level).
    assert jnp.allclose(pe2_out, pe2_ref, atol=1e-4, rtol=1e-4)

    print("KERNEL_OK")
</pallas_src>

<mosaic_0001>
module attributes {stable_mosaic.version = 11 : i64} {
  func.func @_fused_kernel(%arg0: i32, %arg1: memref<2x32xf32, #tpu.memory_space<vmem>>, %arg2: memref<16x32xf32, #tpu.memory_space<vmem>>, %arg3: memref<16x32xf32, #tpu.memory_space<vmem>>, %arg4: memref<16x32xf32, #tpu.memory_space<vmem>>) attributes {dimension_semantics = [#tpu.dimension_semantics<parallel>], iteration_bounds = array<i64: 1>, scalar_prefetch = 0 : i64, scratch_operands = 0 : i64, tpu.core_type = #tpu.core_type<tc>, window_params = [{pipeline_mode = #tpu.pipeline_mode<synchronous>, transform_indices = @transform_0, window_bounds = array<i64: 2, 32>}, {transform_indices = @transform_1, window_bounds = array<i64: 16, 32>}, {transform_indices = @transform_2, window_bounds = array<i64: 16, 32>}, {transform_indices = @transform_3, window_bounds = array<i64: 16, 32>}]} {
    %c0 = arith.constant 0 : index
    %c0_0 = arith.constant 0 : index
    %0 = vector.load %arg2[%c0, %c0_0] : memref<16x32xf32, #tpu.memory_space<vmem>>, vector<16x32xf32>
    %cst = arith.constant 5.65685415 : f32
    %1 = vector.broadcast %cst : f32 to vector<16x32xf32>
    %2 = arith.mulf %0, %1 : vector<16x32xf32>
    %c0_1 = arith.constant 0 : index
    %c0_2 = arith.constant 0 : index
    %3 = vector.load %arg3[%c0_1, %c0_2] : memref<16x32xf32, #tpu.memory_space<vmem>>, vector<16x32xf32>
    tpu.vector_store %arg3[%c0_1, %c0_2], %2 {strides = array<i32>} : memref<16x32xf32, #tpu.memory_space<vmem>>, vector<16x32xf32>,
    %c16_i32 = arith.constant 16 : i32
    %4 = arith.muli %arg0, %c16_i32 : i32
    %5 = tpu.iota {dimensions = array<i32: 0>} : vector<16x1xi32>
    %6 = vector.broadcast %4 : i32 to vector<16x1xi32>
    %7 = arith.addi %6, %5 : vector<16x1xi32>
    %c7_i32 = arith.constant 7 : i32
    %8 = vector.broadcast %c7_i32 : i32 to vector<16x1xi32>
    %9 = arith.subi %8, %7 : vector<16x1xi32>
    %10 = arith.sitofp %9 : vector<16x1xi32> to vector<16x1xf32>
    %c0_3 = arith.constant 0 : index
    %c0_4 = arith.constant 0 : index
    %11 = vector.load %arg1[%c0_3, %c0_4] : memref<2x32xf32, #tpu.memory_space<vmem>>, vector<1x32xf32>
    %c1 = arith.constant 1 : index
    %c0_5 = arith.constant 0 : index
    %12 = vector.load %arg1[%c1, %c0_5] : memref<2x32xf32, #tpu.memory_space<vmem>>, vector<1x32xf32>
    %13 = vector.broadcast %10 : vector<16x1xf32> to vector<16x32xf32>
    %14 = vector.broadcast %11 : vector<1x32xf32> to vector<16x32xf32>
    %15 = arith.mulf %13, %14 : vector<16x32xf32>
    %cst_6 = arith.constant 0.159154937 : f32
    %16 = vector.broadcast %cst_6 : f32 to vector<16x32xf32>
    %17 = arith.mulf %15, %16 : vector<16x32xf32>
    %cst_7 = arith.constant 5.000000e-01 : f32
    %18 = vector.broadcast %cst_7 : f32 to vector<16x32xf32>
    %19 = arith.addf %17, %18 : vector<16x32xf32>
    %20 = math.floor %19 : vector<16x32xf32>
    %cst_8 = arith.constant 6.281250e+00 : f32
    %21 = vector.broadcast %cst_8 : f32 to vector<16x32xf32>
    %22 = arith.mulf %20, %21 : vector<16x32xf32>
    %23 = arith.subf %15, %22 : vector<16x32xf32>
    %cst_9 = arith.constant 0.00193530717 : f32
    %24 = vector.broadcast %cst_9 : f32 to vector<16x32xf32>
    %25 = arith.mulf %20, %24 : vector<16x32xf32>
    %26 = arith.subf %23, %25 : vector<16x32xf32>
    %27 = vector.broadcast %12 : vector<1x32xf32> to vector<16x32xf32>
    %28 = arith.addf %26, %27 : vector<16x32xf32>
    %29 = math.sin %28 : vector<16x32xf32>
    %c0_10 = arith.constant 0 : index
    %c0_11 = arith.constant 0 : index
    %30 = vector.load %arg4[%c0_10, %c0_11] : memref<16x32xf32, #tpu.memory_space<vmem>>, vector<16x32xf32>
    tpu.vector_store %arg4[%c0_10, %c0_11], %29 {strides = array<i32>} : memref<16x32xf32, #tpu.memory_space<vmem>>, vector<16x32xf32>,
    return
  }
  func.func @transform_0(%arg0: i32) -> (i32, i32) {
    %c0_i32 = arith.constant 0 : i32
    %c0_i32_0 = arith.constant 0 : i32
    %c0_i32_1 = arith.constant 0 : i32
    return %c0_i32, %c0_i32_0 : i32, i32
  }
  func.func @transform_1(%arg0: i32) -> (i32, i32) {
    %c0_i32 = arith.constant 0 : i32
    %c0_i32_0 = arith.constant 0 : i32
    return %arg0, %c0_i32 : i32, i32
  }
  func.func @transform_2(%arg0: i32) -> (i32, i32) {
    %c0_i32 = arith.constant 0 : i32
    %c0_i32_0 = arith.constant 0 : i32
    return %arg0, %c0_i32 : i32, i32
  }
  func.func @transform_3(%arg0: i32) -> (i32, i32) {
    %c0_i32 = arith.constant 0 : i32
    %c0_i32_0 = arith.constant 0 : i32
    return %arg0, %c0_i32 : i32, i32
  }
}

</mosaic_0001>

<bundles_post_ra>
// kernel: tpu_custom_call.1
= control target key start
LH: loop header
LB: loop body
LE: loop exit
PB: predicated region body
PF: predicated region fallthrough
CT: control target
= control target key end

     0   :  { %9 = vsyncpa [#allocation3], 0  ;;  %s641_s0 = inlined_call_operand.hbm [shape: f32[2,32], index: 0, kind: input, shape index: {}]   ;;  %s642_s1 = inlined_call_operand.hbm [shape: f32[16,32], index: 1, kind: input, shape index: {}]   ;;  %s643_s2 = inlined_call_operand.hbm [shape: f32[16,32], index: 2, kind: output, shape index: {0}]   ;;  %s644_s3 = inlined_call_operand.hbm [shape: f32[16,32], index: 3, kind: output, shape index: {1}]  }
   0x1   :  { %10 = vsyncpa [#allocation6], 0 }
   0x2   :  { %11 = vsyncpa [#allocation4], 0 }
   0x3   :  { %12 = vsyncpa [#allocation9], 0  ;;  %s465_s12 = smov [#allocation2]   ;;  %s466_s14 = smov [#allocation5]  }
   0x4   :  { %s19_s13 = sshll.u32 %s465_s12, 4  ;;  %s28_s15 = sshll.u32 %s466_s14, 4  ;;  %s20_s13 = int_to_ptr.vmem [resolvable:$true] %s19_s13  ;;  %s497_s15 = int_to_ptr.vmem [resolvable:$true] %s28_s15 }
   0x5   :  { %s369_s18 = scalar_lea.hbm %s641_s0, 32 }
   0x6   :  { %p370_p0 = scmp.ne.s32.totalorder %s641_s0, %s369_s18  ;;  %p373_p1 = scmp.lt.u32.totalorder %s369_s18, %s641_s0 }
   0x8   :  { %p375_p2 = pnand %p373_p1, %p370_p0 }
   0xa   :  { %378 = shalt.err (!%p375_p2)
}
   0xb   :  { %s379_s23 = scalar_lea.vmem %s20_s13, 32  ;;  %p384_p4 = scmp.lt.s32.totalorder %s20_s13, %s20_s13 }
   0xc   :  { %p380_p3 = scmp.ne.s32.totalorder %s20_s13, %s379_s23  ;;  %p385_p5 = scmp.lt.s32.totalorder %s379_s23, %s379_s23 }
   0xe   :  { %p386_p6 = por %p385_p5, %p384_p4 }
  0x10   :  { %p387_p7 = pnand %p386_p6, %p380_p3 }
  0x12   :  { %390 = shalt.err (!%p387_p7)
}
  0x13   :  { %22 = dma.hbm_to_vmem [thread:$0]  %s641_s0, 32, %s20_s13, [#allocation3]  }
  0x14   :  { %s391_s28 = scalar_lea.hbm %s642_s1, 256 }
  0x15   :  { %p392_p8 = scmp.ne.s32.totalorder %s642_s1, %s391_s28  ;;  %p395_p9 = scmp.lt.u32.totalorder %s391_s28, %s642_s1 }
  0x17   :  { %p397_p10 = pnand %p395_p9, %p392_p8 }
  0x19   :  { %400 = shalt.err (!%p397_p10)
}
  0x1a   :  { %s401_s6 = scalar_lea.vmem %s497_s15, 256  ;;  %p406_p12 = scmp.lt.s32.totalorder %s497_s15, %s497_s15 }
  0x1b   :  { %p402_p11 = scmp.ne.s32.totalorder %s497_s15, %s401_s6  ;;  %p407_p13 = scmp.lt.s32.totalorder %s401_s6, %s401_s6 }
  0x1d   :  { %p408_p0 = por %p407_p13, %p406_p12 }
  0x1f   :  { %p409_p1 = pnand %p408_p0, %p402_p11 }
  0x21   :  { %412 = shalt.err (!%p409_p1)
}
  0x22   :  { %s467_s0 = smov 128   ;;  %s468_s7 = smov 8  }
  0x23   :  { %34 = dma.hbm_to_vmem [thread:$0]  %s642_s1, 256, %s497_s15, [#allocation6], %s467_s0, %s467_s0, %s468_s7  }
  0x24   :  { %457 = dma.done.wait [#allocation3], 32  }
  0x25   :  { %458 = vsyncadd [#allocation3], 4294967264 }
  0x26   :  { %459 = dma.done.wait [#allocation6], 256  }
  0x27   :  { %460 = vsyncadd [#allocation6], 4294967040  ;;  %v49_v0 = vlaneseq  ;;  %s469_s10 = smov [#allocation7]   ;;  %v41_v6 = vld [vmem:[#allocation5] sm:$0xff]  ;;  %vm45_vm0 = vcmask 261120   ;;  %v42_v7 = vld [vmem:[#allocation5 + $0x8] sm:$0xff] }
  0x28   :  { %s302_s11 = sshll.u32 %s469_s10, 4  ;;  %v331_v8 = vld [vmem:[#allocation2] ss:$0 sm:$0xff]  ;;  %v43_v9 = vmul.f32 5.656854, %v41_v6  ;;  %s303_s11 = int_to_ptr.vmem [resolvable:$true] %s302_s11 }
  0x29   :  { %v50_v1 = vshrl.u32 %v49_v0, 7  ;;  %v44_v10 = vmul.f32 5.656854, %v42_v7  ;;  %s413_s1 = scalar_lea.vmem %s303_s11, 256  ;;  %p418_p3 = scmp.lt.s32.totalorder %s303_s11, %s303_s11 }
  0x2a   :  { %46 = vst.msk [vmem:[#allocation7] sm:$0xff] %vm45_vm0, %v43_v9  ;;  %p414_p2 = scmp.ne.s32.totalorder %s303_s11, %s413_s1  ;;  %p419_p4 = scmp.lt.s32.totalorder %s413_s1, %s413_s1 }
  0x2b   :  { %v55_v2 = vsub.s32 7, %v50_v1  ;;  %v51_v3 = vadd.s32 8, %v50_v1  ;;  %47 = vst.msk [vmem:[#allocation7 + $0x8] sm:$0xff] %vm45_vm0, %v44_v10 }
  0x2c   :  { %p420_p5 = por %p419_p4, %p418_p3 }
  0x2d   :  { %v57_v4 = vcvt.s32.f32 %v55_v2  ;;  %v56_v5 = vsub.s32 7, %v51_v3 }
  0x2e   :  { %p421_p6 = pnand %p420_p5, %p414_p2 }
  0x2f   :  { %v65_v11 = vmul.f32 %v331_v8, %v57_v4  ;;  %v58_v12 = vcvt.s32.f32 %v56_v5 }
  0x31   :  { %v67_v13 = vmul.f32 0.15915494, %v65_v11  ;;  %v66_v14 = vmul.f32 %v331_v8, %v58_v12 }
  0x32   :  { %424 = shalt.err (!%p421_p6)
}
  0x33   :  { %s425_s14 = scalar_lea.hbm %s643_s2, 256 }
  0x34   :  { %p426_p7 = scmp.ne.s32.totalorder %s643_s2, %s425_s14  ;;  %p429_p8 = scmp.lt.u32.totalorder %s425_s14, %s643_s2 }
  0x36   :  { %p431_p9 = pnand %p429_p8, %p426_p7 }
  0x38   :  { %434 = shalt.err (!%p431_p9)
}
  0x39   :  { %308 = dma.vmem_to_hbm [thread:$0]  %s303_s11, 256, %s643_s2, [#allocation4], %s467_s0, %s467_s0, %s468_s7   ;;  %v69_v15 = vadd.f32 0.5, %v67_v13  ;;  %v68_v16 = vmul.f32 0.15915494, %v66_v14 }
  0x3a   :  { %v332_v25 = vld [vmem:[#allocation2 + $0x1] ss:$0 sm:$0xff]  ;;  %v470_v50 = vmov 683565275   ;;  %v471_v52 = vmov 2475754826  }
  0x3b   :  { %v71_v17 = vfloor.f32 %v69_v15  ;;  %v70_v18 = vadd.f32 0.5, %v68_v16  ;;  %v472_v54 = vmov 2131351028   ;;  %v473_v56 = vmov 2102212464   ;;  %s476_s2 = smov [#allocation8]  }
  0x3c   :  { %v474_v58 = vmov 920167782   ;;  %v475_v1 = vmov 1326507024   ;;  %s314_s21 = sshll.u32 %s476_s2, 4  ;;  %s315_s21 = int_to_ptr.vmem [resolvable:$true] %s314_s21 }
  0x3d   :  { %v73_v19 = vmul.f32 6.28125, %v71_v17  ;;  %v77_v20 = vmul.f32 0.0019353072, %v71_v17  ;;  %v72_v21 = vfloor.f32 %v70_v18  ;;  %s435_s22 = scalar_lea.vmem %s315_s21, 256  ;;  %p440_p11 = scmp.lt.s32.totalorder %s315_s21, %s315_s21 }
  0x3e   :  { %p436_p10 = scmp.ne.s32.totalorder %s315_s21, %s435_s22  ;;  %p441_p12 = scmp.lt.s32.totalorder %s435_s22, %s435_s22 }
  0x3f   :  { %v75_v22 = vsub.f32 %v65_v11, %v73_v19  ;;  %v74_v23 = vmul.f32 6.28125, %v72_v21  ;;  %v78_v24 = vmul.f32 0.0019353072, %v72_v21 }
  0x40   :  { %p442_p13 = por %p441_p12, %p440_p11 }
  0x41   :  { %v79_v26 = vsub.f32 %v75_v22, %v77_v20  ;;  %v76_v27 = vsub.f32 %v66_v14, %v74_v23 }
  0x42   :  { %p443_p0 = pnand %p442_p13, %p436_p10 }
  0x43   :  { %v548_v28 = vadd.f32 %v332_v25, %v79_v26  ;;  %v80_v29 = vsub.f32 %v76_v27, %v78_v24 }
  0x45   :  { %v87_v30 = vand.u32 2147483647, %v548_v28  ;;  %v90_v31 = vand.u32 2139095040, %v548_v28  ;;  %v552_v32 = vadd.f32 %v332_v25, %v80_v29  ;;  %vm89_vm15 = vcmp.lt.s32.totalorder %v548_v28, 0 }
  0x47   :  { %v91_v33 = vshrl.u32 %v90_v31, 23  ;;  %v94_v34 = vand.u32 8388607, %v87_v30  ;;  %v191_v35 = vand.u32 2147483647, %v552_v32  ;;  %v194_v36 = vand.u32 2139095040, %v552_v32 }
  0x49   :  { %v333_v37 = vadd.s32 4294967169, %v91_v33  ;;  %v195_v38 = vshrl.u32 %v194_v36, 23  ;;  %v95_v40 = vor.u32 8388608, %v94_v34  ;;  %v560_v42 = vand.u32 8388607, %v191_v35 }
  0x4b   :  { %v97_v39 = vadd.s32 1, %v333_v37  ;;  %v337_v41 = vadd.s32 4294967169, %v195_v38  ;;  %v562_v47 = vshll.u32 %v95_v40, 8  ;;  %v199_v48 = vor.u32 8388608, %v560_v42 }
  0x4d   :  { %vm98_vm1 = vcmp.gt.s32.totalorder %v97_v39, 0  ;;  %v201_v44 = vadd.s32 1, %v337_v41 }
  0x4e   :  { %v99_v43 = vsel %vm98_vm1, %v97_v39, 0  ;;  %vm88_vm1 = vcmp.le.f32.partialorder %v87_v30, 0.7853982 }
  0x4f   :  { %v100_v45 = vshrl.u32 %v99_v43, 5  ;;  %v101_v46 = vand.u32 31, %v99_v43  ;;  %vm202_vm2 = vcmp.gt.s32.totalorder %v201_v44, 0 }
  0x50   :  { %v203_v6 = vsel %vm202_vm2, %v201_v44, 0  ;;  %vm193_vm2 = vcmp.lt.s32.totalorder %v552_v32, 0 }
  0x51   :  { %v102_v49 = vsub.s32 32, %v101_v46  ;;  %v104_v51 = vshll.u32 %v470_v50, %v101_v46  ;;  %v107_v53 = vshll.u32 %v471_v52, %v101_v46  ;;  %v110_v55 = vshll.u32 %v472_v54, %v101_v46 }
  0x52   :  { %v113_v57 = vshll.u32 %v473_v56, %v101_v46  ;;  %v116_v59 = vshll.u32 %v474_v58, %v101_v46  ;;  %vm119_vm3 = vcmp.lt.s32.totalorder %v100_v45, 1  ;;  %vm120_vm4 = vcmp.lt.s32.totalorder %v100_v45, 2 }
  0x53   :  { %v103_v60 = vshrl.u32 %v470_v50, %v102_v49  ;;  %v105_v61 = vshrl.u32 %v471_v52, %v102_v49  ;;  %v108_v62 = vshrl.u32 %v472_v54, %v102_v49  ;;  %v111_v63 = vshrl.u32 %v473_v56, %v102_v49 }
  0x54   :  { %v114_v0 = vshrl.u32 %v474_v58, %v102_v49  ;;  %v117_v2 = vshrl.u32 %v475_v1, %v102_v49  ;;  %vm121_vm5 = vcmp.lt.s32.totalorder %v100_v45, 3  ;;  %vm122_vm6 = vcmp.lt.s32.totalorder %v100_v45, 4 }
  0x55   :  { %v106_v3 = vor.u32 %v105_v61, %v104_v51  ;;  %v109_v4 = vor.u32 %v108_v62, %v107_v53  ;;  %v112_v5 = vor.u32 %v111_v63, %v110_v55  ;;  %v204_v9 = vshrl.u32 %v203_v6, 5 }
  0x56   :  { %v115_v7 = vor.u32 %v114_v0, %v113_v57  ;;  %v118_v8 = vor.u32 %v117_v2, %v116_v59  ;;  %v205_v10 = vand.u32 31, %v203_v6 }
  0x57   :  { %v123_v11 = vsel %vm119_vm3, %v103_v60, %v106_v3  ;;  %v124_v12 = vsel %vm122_vm6, %v112_v5, 2102212464  ;;  %v127_v13 = vsel %vm119_vm3, %v106_v3, %v109_v4  ;;  %v131_v14 = vsel %vm119_vm3, %v109_v4, %v112_v5 }
  0x58   :  { %v125_v15 = vsel %vm121_vm5, %v109_v4, %v124_v12  ;;  %v128_v16 = vsel %vm122_vm6, %v115_v7, 920167782  ;;  %v132_v17 = vsel %vm122_vm6, %v118_v8, 1326507024  ;;  %v206_v18 = vsub.s32 32, %v205_v10 }
  0x59   :  { %v126_v19 = vsel %vm120_vm4, %v123_v11, %v125_v15  ;;  %v129_v20 = vsel %vm121_vm5, %v112_v5, %v128_v16  ;;  %v133_v21 = vsel %vm121_vm5, %v115_v7, %v132_v17  ;;  %v208_v22 = vshll.u32 %v470_v50, %v205_v10 }
  0x5a   :  { %v130_v23 = vsel %vm120_vm4, %v127_v13, %v129_v20  ;;  %v134_v24 = vsel %vm120_vm4, %v131_v14, %v133_v21  ;;  %v142_v25 = vmul.u32 %v562_v47, %v126_v19  ;;  %v207_v26 = vshrl.u32 %v470_v50, %v206_v18 }
  0x5b   :  { %v577_v27 = vmul.u32.u64.low %v562_v47, %v134_v24  ;;  %v578_v29 = vmul.u32.u64.high %v562_v47, %v134_v24, %v577_v27  ;;  %v581_v31 = vmul.u32.u64.low %v562_v47, %v130_v23  ;;  %v582_v33 = vmul.u32.u64.high %v562_v47, %v130_v23, %v581_v31 }
  0x5c   :  { %v209_v34 = vshrl.u32 %v471_v52, %v206_v18  ;;  %v211_v36 = vshll.u32 %v471_v52, %v205_v10  ;;  %v212_v37 = vshrl.u32 %v472_v54, %v206_v18  ;;  %v214_v38 = vshll.u32 %v472_v54, %v205_v10 }
  0x5d   :  { %v215_v39 = vshrl.u32 %v473_v56, %v206_v18  ;;  %v217_v40 = vshll.u32 %v473_v56, %v205_v10  ;;  %v218_v41 = vshrl.u32 %v474_v58, %v206_v18  ;;  %v220_v43 = vshll.u32 %v474_v58, %v205_v10 }
  0x5e   :  { %v210_v44 = vor.u32 %v209_v34, %v208_v22  ;;  %v213_v45 = vor.u32 %v212_v37, %v211_v36  ;;  %v221_v46 = vshrl.u32 %v475_v1, %v206_v18  ;;  %vm223_vm7 = vcmp.lt.s32.totalorder %v204_v9, 1 }
  0x5f   :  { %vm144_vm8 = vc.u32 %v578_v29, %v581_v31  ;;  %v145_v49 = vadd.s32 1, %v582_v33  ;;  %v216_v50 = vor.u32 %v215_v39, %v214_v38  ;;  %v239_v47 = vshll.u32 %v199_v48, 8 }
  0x60   :  { %v219_v51 = vor.u32 %v218_v41, %v217_v40  ;;  %v222_v52 = vor.u32 %v221_v46, %v220_v43  ;;  %vm224_vm9 = vcmp.lt.s32.totalorder %v204_v9, 2  ;;  %vm225_vm10 = vcmp.lt.s32.totalorder %v204_v9, 3 }
  0x61   :  { %v146_v53 = vsel %vm144_vm8, %v145_v49, %v582_v33  ;;  %vm226_vm11 = vcmp.lt.s32.totalorder %v204_v9, 4  ;;  %v227_v54 = vsel %vm223_vm7, %v207_v26, %v210_v44  ;;  %v231_v55 = vsel %vm223_vm7, %v210_v44, %v213_v45 }
  0x62   :  { %v147_v56 = vadd.s32 %v146_v53, %v142_v25  ;;  %v228_v57 = vsel %vm226_vm11, %v216_v50, 2102212464  ;;  %v232_v58 = vsel %vm226_vm11, %v219_v51, 920167782  ;;  %v235_v59 = vsel %vm223_vm7, %v213_v45, %v216_v50 }
  0x63   :  { %v229_v60 = vsel %vm225_vm10, %v213_v45, %v228_v57  ;;  %v233_v61 = vsel %vm225_vm10, %v216_v50, %v232_v58  ;;  %v236_v42 = vsel %vm226_vm11, %v222_v52, 1326507024  ;;  %v143_v20 = vadd.s32 %v581_v31, %v578_v29 }
  0x64   :  { %v148_v48 = vadd.s32 536870912, %v147_v56  ;;  %v234_v62 = vsel %vm224_vm9, %v231_v55, %v233_v61  ;;  %v237_v63 = vsel %vm225_vm10, %v219_v51, %v236_v42  ;;  %v230_v0 = vsel %vm224_vm9, %v227_v54, %v229_v60 }
  0x65   :  { %v238_v1 = vsel %vm224_vm9, %v235_v59, %v237_v63  ;;  %v595_v2 = vmul.u32.u64.low %v239_v47, %v234_v62  ;;  %v596_v3 = vmul.u32.u64.high %v239_v47, %v234_v62, %v595_v2  ;;  %v246_v8 = vmul.u32 %v239_v47, %v230_v0 }
  0x66   :  { %v149_v4 = vshrl.u32 %v148_v48, 30  ;;  %v598_v5 = vmul.u32.u64.low %v239_v47, %v238_v1  ;;  %v599_v6 = vmul.u32.u64.high %v239_v47, %v238_v1, %v598_v5  ;;  %vm613_vm3 = vcmp.le.f32.partialorder %v191_v35, 0.7853982 }
  0x67   :  { %v249_v10 = vadd.s32 1, %v596_v3  ;;  %vm179_vm7 = vweird.f32 %v548_v28  ;;  %vm283_vm11 = vweird.f32 %v552_v32 }
  0x68   :  { %v150_v7 = vshll.u32 %v149_v4, 30  ;;  %vm248_vm12 = vc.u32 %v599_v6, %v595_v2  ;;  %v173_v44 = vsub.s32 4, %v149_v4  ;;  %v247_v29 = vadd.s32 %v595_v2, %v599_v6 }
  0x69   :  { %v250_v12 = vsel %vm248_vm12, %v249_v10, %v596_v3 }
  0x6a   :  { %v151_v11 = vsub.s32 %v147_v56, %v150_v7  ;;  %v251_v14 = vadd.s32 %v250_v12, %v246_v8  ;;  %v174_v51 = vsel %vm89_vm15, %v173_v44, %v149_v4 }
  0x6b   :  { %v176_v56 = vsel %vm88_vm1, 0, %v174_v51 }
  0x6c   :  { %v153_v13 = vsub.s32 0, %v151_v11  ;;  %v252_v15 = vadd.s32 536870912, %v251_v14  ;;  %v180_v61 = vadd.s32 3, %v176_v56 }
  0x6e   :  { %v334_v9 = vmin.u32 %v153_v13, %v151_v11  ;;  %v253_v17 = vshrl.u32 %v252_v15, 30  ;;  %v181_v63 = vand.u32 3, %v180_v61 }
  0x70   :  { %v155_v16 = vclz %v334_v9  ;;  %v254_v19 = vshll.u32 %v253_v17, 30  ;;  %v277_v48 = vsub.s32 4, %v253_v17  ;;  %vm186_vm4 = vcmp.eq.s32.totalorder %v181_v63, 2 }
  0x71   :  { %vm183_vm5 = vcmp.eq.s32.totalorder %v181_v63, 0  ;;  %vm182_vm6 = vcmp.lt.s32.totalorder %v181_v63, 2 }
  0x72   :  { %v335_v18 = vadd.s32 4294967294, %v155_v16  ;;  %v255_v22 = vsub.s32 %v251_v14, %v254_v19  ;;  %v278_v1 = vsel %vm193_vm2, %v277_v48, %v253_v17 }
  0x73   :  { %v280_v5 = vsel %vm613_vm3, 0, %v278_v1 }
  0x74   :  { %vm336_vm13 = vcmp.lt.s32.totalorder %v335_v18, 0  ;;  %v257_v26 = vsub.s32 0, %v255_v22  ;;  %v284_v10 = vadd.s32 3, %v280_v5 }
  0x75   :  { %v158_v21 = vsel %vm336_vm13, 0, %v335_v18 }
  0x76   :  { %v159_v23 = vsub.s32 32, %v158_v21  ;;  %v160_v24 = vshll.u32 %v151_v11, %v158_v21  ;;  %v163_v25 = vsub.s32 4294967266, %v158_v21  ;;  %v338_v34 = vmin.u32 %v257_v26, %v255_v22 }
  0x77   :  { %v285_v14 = vand.u32 3, %v284_v10 }
  0x78   :  { %v161_v27 = vshrl.u32 %v143_v20, %v159_v23  ;;  %v164_v33 = vadd.s32 127, %v163_v25  ;;  %v259_v38 = vclz %v338_v34 }
  0x79   :  { %vm290_vm8 = vcmp.eq.s32.totalorder %v285_v14, 2  ;;  %vm287_vm9 = vcmp.eq.s32.totalorder %v285_v14, 0  ;;  %vm286_vm10 = vcmp.lt.s32.totalorder %v285_v14, 2 }
  0x7a   :  { %v162_v36 = vor.u32 %v161_v27, %v160_v24  ;;  %v165_v37 = vshll.u32 %v164_v33, 23  ;;  %v339_v41 = vadd.s32 4294967294, %v259_v38 }
  0x7c   :  { %v166_v39 = vor.u32 4788187, %v165_v37  ;;  %v169_v40 = vcvt.s32.f32 %v162_v36  ;;  %vm340_vm14 = vcmp.lt.s32.totalorder %v339_v41, 0 }
  0x7d   :  { %v262_v45 = vsel %vm340_vm14, 0, %v339_v41 }
  0x7e   :  { %v167_v43 = vand.u32 2147483647, %v166_v39  ;;  %v263_v46 = vsub.s32 32, %v262_v45  ;;  %v264_v49 = vshll.u32 %v255_v22, %v262_v45  ;;  %v267_v50 = vsub.s32 4294967266, %v262_v45 }
  0x80   :  { %v170_v31 = vmul.f32 %v169_v40, %v167_v43  ;;  %v265_v52 = vshrl.u32 %v247_v29, %v263_v46  ;;  %v268_v53 = vadd.s32 127, %v267_v50 }
  0x82   :  { %v171_v47 = vxor.u32 2147483648, %v170_v31  ;;  %v266_v57 = vor.u32 %v265_v52, %v264_v49  ;;  %v269_v58 = vshll.u32 %v268_v53, 23 }
  0x84   :  { %v172_v54 = vsel %vm89_vm15, %v171_v47, %v170_v31  ;;  %v270_v59 = vor.u32 4788187, %v269_v58  ;;  %v273_v60 = vcvt.s32.f32 %v266_v57 }
  0x85   :  { %v175_v55 = vsel %vm88_vm1, %v548_v28, %v172_v54 }
  0x86   :  { %361 = vcosq.f32 %v175_v55  ;;  %v271_v42 = vand.u32 2147483647, %v270_v59 }
  0x87   :  { %363 = vsinq.f32 %v175_v55 }
  0x88   :  { %v274_v62 = vmul.f32 %v273_v60, %v271_v42 }
  0x8a   :  { %v275_v0 = vxor.u32 2147483648, %v274_v62 }
  0x8c   :  { %v276_v2 = vsel %vm193_vm2, %v275_v0, %v274_v62 }
  0x8d   :  { %v279_v4 = vsel %vm613_vm3, %v552_v32, %v276_v2 }
  0x8e   :  { %365 = vcosq.f32 %v279_v4 }
  0x8f   :  { %367 = vsinq.f32 %v279_v4 }
  0x90   :  { %v362_v3 = vpop.eup %361 }
  0x91   :  { %v364_v6 = vpop.eup %363  ;;  %v187_v7 = vxor.u32 2147483648, %v362_v3 }
  0x92   :  { %v184_v35 = vxor.u32 2147483648, %v364_v6 }
  0x93   :  { %v188_v8 = vsel %vm186_vm4, %v187_v7, %v364_v6 }
  0x94   :  { %v185_v11 = vsel %vm183_vm5, %v362_v3, %v184_v35 }
  0x95   :  { %v189_v12 = vsel %vm182_vm6, %v185_v11, %v188_v8 }
  0x96   :  { %v190_v13 = vsel %vm179_vm7, nan, %v189_v12 }
  0x97   :  { %295 = vst.msk [vmem:[#allocation8] sm:$0xff] %vm45_vm0, %v190_v13 }
  0x98   :  { %v366_v9 = vpop.eup %365 }
  0x99   :  { %v368_v15 = vpop.eup %367  ;;  %v291_v16 = vxor.u32 2147483648, %v366_v9 }
  0x9a   :  { %v288_v17 = vxor.u32 2147483648, %v368_v15 }
  0x9b   :  { %v292_v28 = vsel %vm290_vm8, %v291_v16, %v368_v15 }
  0x9c   :  { %v289_v18 = vsel %vm287_vm9, %v366_v9, %v288_v17 }
  0x9d   :  { %v293_v19 = vsel %vm286_vm10, %v289_v18, %v292_v28 }
  0x9e   :  { %v294_v20 = vsel %vm283_vm11, nan, %v293_v19 }
  0x9f   :  { %296 = vst.msk [vmem:[#allocation8 + $0x8] sm:$0xff] %vm45_vm0, %v294_v20 }
  0xa0   :  { %446 = shalt.err (!%p443_p0)
}
  0xa1   :  { %s447_s25 = scalar_lea.hbm %s644_s3, 256 }
  0xa2   :  { %p448_p1 = scmp.ne.s32.totalorder %s644_s3, %s447_s25  ;;  %p451_p2 = scmp.lt.u32.totalorder %s447_s25, %s644_s3 }
  0xa4   :  { %p453_p3 = pnand %p451_p2, %p448_p1 }
  0xa6   :  { %456 = shalt.err (!%p453_p3)
}
  0xa7   :  { %320 = dma.vmem_to_hbm [thread:$0]  %s315_s21, 256, %s644_s3, [#allocation9], %s467_s0, %s467_s0, %s468_s7  }
  0xa8   :  { %461 = dma.done.wait [#allocation4], 256  }
  0xa9   :  { %462 = vsyncadd [#allocation4], 4294967040 }
  0xaa   :  { %463 = dma.done.wait [#allocation9], 256  }
  0xab   :  { %464 = vsyncadd [#allocation9], 4294967040 }
  0xac   :  { %327 = vsyncpa [#allocation3], 1 }
  0xad   :  { %328 = vsyncpa [#allocation6], 1 }
  0xae   :  { %329 = vsyncpa [#allocation4], 1 }
  0xaf   :  { %330 = vsyncpa [#allocation9], 1 }

</bundles_post_ra>
